<compile_context>
chip_gen: v7x
topology: tpu7x:2x2x1
jax: 0.10.0
libtpu: 0.0.40
codegen_flags: <defaults>
</compile_context>

<pallas_src>
import jax
import jax.numpy as jnp
import numpy as np
from jax.experimental import pallas as pl
from jax.experimental.pallas import tpu as pltpu

LANE = 128          # padded hidden width (lane dim of activations)
SUBLANE_BF16 = 16   # bf16 sublane packing granule
OUT_ROWS = 8        # sublane padding of the transposed head weight


def _round_up(n, m):
    return ((n + m - 1) // m) * m


# ---------------------------------------------------------------------------
# Kernel: fused 3-hidden-layer MLP + linear head for one batch tile.
#   x_ref   : [TB, D_in]           f32   (cast to bf16 in-kernel)
#   wK_ref  : [*, 128]             bf16  (hidden zero-padded to 128)
#   bK_ref  : [1, 128]             f32
#   wot_ref : [OUT_ROWS, 128]      bf16  (transposed head weight, zero-padded)
#   bo_ref  : [OUT_ROWS, 1]        f32
#   o_ref   : [1, output_dim, TB]  f32   (batch along lanes -> lane-dense)
# ---------------------------------------------------------------------------
def _mlp_kernel(x_ref, w0_ref, b0_ref, w1_ref, b1_ref, w2_ref, b2_ref,
                wot_ref, bo_ref, o_ref):
    # layer 0: Linear(input_dim, hidden) + ReLU  (dropout = identity in eval)
    x = x_ref[...].astype(jnp.bfloat16)
    h = jnp.dot(x, w0_ref[...],
                preferred_element_type=jnp.float32) + b0_ref[...]
    h = jnp.maximum(h, 0.0).astype(jnp.bfloat16)

    # layer 1: Linear(hidden, hidden) + ReLU
    h = jnp.dot(h, w1_ref[...],
                preferred_element_type=jnp.float32) + b1_ref[...]
    h = jnp.maximum(h, 0.0).astype(jnp.bfloat16)

    # layer 2: Linear(hidden, hidden) + ReLU
    h = jnp.dot(h, w2_ref[...],
                preferred_element_type=jnp.float32) + b2_ref[...]
    h = jnp.maximum(h, 0.0).astype(jnp.bfloat16)

    # output head, batch along lanes:  o[o, b] = sum_h wot[o, h] * h[b, h]
    o = jnp.einsum('oh,bh->ob', wot_ref[...], h,
                   preferred_element_type=jnp.float32) + bo_ref[...]
    # write only the real output rows (padded rows 1..OUT_ROWS-1 discarded)
    o_ref[0] = o[:o_ref.shape[1], :]


# ---------------------------------------------------------------------------
# Parameter padding: hidden -> 128 lanes, head weight transposed and padded to
# OUT_ROWS sublanes, weights bf16 / biases f32.  Zero padding is exactly
# forward-preserving (padded hidden columns stay relu(0)=0).
# ---------------------------------------------------------------------------
def pad_params_for_tpu(params):
    def pad2(a, rows, cols):
        return jnp.pad(a, ((0, rows - a.shape[0]), (0, cols - a.shape[1])))

    input_dim = params["w0"].shape[0]
    output_dim = params["wo"].shape[1]
    out_rows = _round_up(max(output_dim, 1), OUT_ROWS)
    return dict(
        w0=pad2(params["w0"], input_dim, LANE).astype(jnp.bfloat16),
        b0=pad2(params["b0"], 1, LANE).astype(jnp.float32),
        w1=pad2(params["w1"], LANE, LANE).astype(jnp.bfloat16),
        b1=pad2(params["b1"], 1, LANE).astype(jnp.float32),
        w2=pad2(params["w2"], LANE, LANE).astype(jnp.bfloat16),
        b2=pad2(params["b2"], 1, LANE).astype(jnp.float32),
        wot=pad2(params["wo"].T, out_rows, LANE).astype(jnp.bfloat16),
        bot=pad2(params["bo"].T, out_rows, 1).astype(jnp.float32),
    )


# ---------------------------------------------------------------------------
# Tile selection: tiny batches -> one grid-less call; otherwise >=2 tiles
# (even count when possible, so both v7x TensorCores get work), each a
# multiple of 16 rows, capped by block_batch.
# ---------------------------------------------------------------------------
def _choose_tiles(batch, block_batch):
    block_batch = _round_up(max(int(block_batch), SUBLANE_BF16), SUBLANE_BF16)
    if batch <= 2 * SUBLANE_BF16:
        return batch, 1                      # grid-less single tile
    if batch <= block_batch:
        n = 2                                # two tiles -> both v7x TCs busy
    else:
        n = pl.cdiv(batch, block_batch)
        n += n % 2                           # even tile count for megacore
    tb = _round_up(pl.cdiv(batch, n), SUBLANE_BF16)
    n_tiles = pl.cdiv(batch, tb)
    return tb, n_tiles


# ---------------------------------------------------------------------------
# Wrapper.
# ---------------------------------------------------------------------------
def presentation_rating_nn_forward(x, params, *, block_batch=2048):
    x = jnp.asarray(x, jnp.float32)
    batch, input_dim = x.shape
    output_dim = params["wo"].shape[1]

    p = pad_params_for_tpu(params)
    weights = (p["w0"], p["b0"], p["w1"], p["b1"],
               p["w2"], p["b2"], p["wot"], p["bot"])

    tb, n_tiles = _choose_tiles(batch, block_batch)

    total_rows = n_tiles * tb
    flops = 2 * total_rows * (input_dim * LANE + 2 * LANE * LANE
                              + LANE * p["wot"].shape[0])
    bytes_accessed = (batch * input_dim * 4
                      + sum(int(np.prod(a.shape)) * a.dtype.itemsize
                            for a in weights)
                      + n_tiles * output_dim * tb * 4)
    cost = pl.CostEstimate(flops=flops, transcendentals=0,
                           bytes_accessed=bytes_accessed)

    if n_tiles == 1:
        # Tiny batch: grid-less fused call, no pipeline bookkeeping.
        out_p = pl.pallas_call(
            _mlp_kernel,
            out_shape=jax.ShapeDtypeStruct((1, output_dim, tb), jnp.float32),
            cost_estimate=cost,
        )(x, *weights)
    else:
        # Batch-tiled streaming MLP: x tiled (ragged last block OK), weights &
        # biases VMEM-resident, output lane-packed per tile, parallel batch
        # axis so v7x's 2 TensorCores split the tiles.
        def resident(arr):
            return pl.BlockSpec(arr.shape, lambda i: (0, 0))

        in_specs = ([pl.BlockSpec((tb, input_dim), lambda i: (i, 0))]
                    + [resident(a) for a in weights])
        out_specs = pl.BlockSpec((1, output_dim, tb), lambda i: (i, 0, 0))

        cp_kwargs = dict(dimension_semantics=("parallel",))
        if tb >= 8192:  # only needed if tiles are pushed very large (v5e 16MiB)
            cp_kwargs["vmem_limit_bytes"] = 64 * 1024 * 1024

        out_p = pl.pallas_call(
            _mlp_kernel,
            out_shape=jax.ShapeDtypeStruct((n_tiles, output_dim, tb),
                                           jnp.float32),
            grid=(n_tiles,),
            in_specs=in_specs,
            out_specs=out_specs,
            compiler_params=pltpu.CompilerParams(**cp_kwargs),
            cost_estimate=cost,
        )(x, *weights)

    # (n_tiles, out_dim, tb) -> (n_tiles*tb, out_dim); only ~4 B/row moved.
    return jnp.swapaxes(out_p, 1, 2).reshape(-1, output_dim)[:batch]


# ---------------------------------------------------------------------------
# Deterministic PyTorch-style init and a pure-JAX f32 reference (eval mode).
# ---------------------------------------------------------------------------
def init_params(key, input_dim, hidden_size, output_dim):
    def linear(key, fan_in, fan_out):
        kw, kb = jax.random.split(key)
        bound = 1.0 / np.sqrt(fan_in)
        w = jax.random.uniform(kw, (fan_in, fan_out), jnp.float32, -bound, bound)
        b = jax.random.uniform(kb, (1, fan_out), jnp.float32, -bound, bound)
        return w, b

    k0, k1, k2, ko = jax.random.split(key, 4)
    w0, b0 = linear(k0, input_dim, hidden_size)
    w1, b1 = linear(k1, hidden_size, hidden_size)
    w2, b2 = linear(k2, hidden_size, hidden_size)
    wo, bo = linear(ko, hidden_size, output_dim)
    return dict(w0=w0, b0=b0, w1=w1, b1=b1, w2=w2, b2=b2, wo=wo, bo=bo)


def reference_forward(x, p):
    h = x
    for w, b in ((p["w0"], p["b0"]), (p["w1"], p["b1"]), (p["w2"], p["b2"])):
        h = jnp.maximum(h @ w + b, 0.0)   # activation=ReLU, dropout=eval identity
    return h @ p["wo"] + p["bo"]


if __name__ == "__main__":
    # PresentationRatingNN(input_dim=16, hidden_size=32, num_layers=3,
    #                      dropout_rate=0.1, activation=ReLU, output_dim=1)
    input_dim, hidden_size, output_dim = 16, 32, 1

    key = jax.random.PRNGKey(0)
    kx1, kx2, kp = jax.random.split(key, 3)
    params = init_params(kp, input_dim, hidden_size, output_dim)

    # --- tiny batch: grid-less fused kernel ---------------------------------
    x_small = jax.random.normal(kx1, (8, input_dim), jnp.float32)
    out_small = jax.block_until_ready(
        presentation_rating_nn_forward(x_small, params))
    ref_small = reference_forward(x_small, params)
    np.testing.assert_allclose(np.asarray(out_small), np.asarray(ref_small),
                               rtol=5e-2, atol=5e-2)  # bf16 operands, f32 acc
    assert out_small.shape == (8, output_dim)

    # --- larger batch: batch-tiled grid (2 parallel tiles, resident weights) -
    x_big = jax.random.normal(kx2, (300, input_dim), jnp.float32)
    out_big = jax.block_until_ready(
        presentation_rating_nn_forward(x_big, params))
    ref_big = reference_forward(x_big, params)
    np.testing.assert_allclose(np.asarray(out_big), np.asarray(ref_big),
                               rtol=5e-2, atol=5e-2)
    assert out_big.shape == (300, output_dim)

    print("KERNEL_OK")
</pallas_src>

<mosaic_0001>
module attributes {stable_mosaic.version = 11 : i64} {
  func.func @_mlp_kernel(%arg0: memref<8x16xf32, #tpu.memory_space<vmem>>, %arg1: memref<16x128xbf16, #tpu.memory_space<vmem>>, %arg2: memref<1x128xf32, #tpu.memory_space<vmem>>, %arg3: memref<128x128xbf16, #tpu.memory_space<vmem>>, %arg4: memref<1x128xf32, #tpu.memory_space<vmem>>, %arg5: memref<128x128xbf16, #tpu.memory_space<vmem>>, %arg6: memref<1x128xf32, #tpu.memory_space<vmem>>, %arg7: memref<8x128xbf16, #tpu.memory_space<vmem>>, %arg8: memref<8x1xf32, #tpu.memory_space<vmem>>, %arg9: memref<1x1x8xf32, #tpu.memory_space<vmem>>) attributes {dimension_semantics = [], scalar_prefetch = 0 : i64, scratch_operands = 0 : i64, tpu.core_type = #tpu.core_type<tc>} {
    %c0 = arith.constant 0 : index
    %c0_0 = arith.constant 0 : index
    %0 = vector.load %arg0[%c0, %c0_0] : memref<8x16xf32, #tpu.memory_space<vmem>>, vector<8x16xf32>
    %1 = arith.truncf %0 : vector<8x16xf32> to vector<8x16xbf16>
    %c0_1 = arith.constant 0 : index
    %c0_2 = arith.constant 0 : index
    %2 = vector.load %arg1[%c0_1, %c0_2] : memref<16x128xbf16, #tpu.memory_space<vmem>>, vector<16x128xbf16>
    %cst = arith.constant dense<0.000000e+00> : vector<8x128xf32>
    %3 = tpu.matmul %1, %2, %cst {dimension_numbers = #tpu.dot_dimension_numbers<[1], [0], [0], [1], [0, 0, 1, 1], [], []>} : vector<8x16xbf16>, vector<16x128xbf16>, vector<8x128xf32> -> vector<8x128xf32>
    %c0_3 = arith.constant 0 : index
    %c0_4 = arith.constant 0 : index
    %4 = vector.load %arg2[%c0_3, %c0_4] : memref<1x128xf32, #tpu.memory_space<vmem>>, vector<1x128xf32>
    %5 = vector.broadcast %4 : vector<1x128xf32> to vector<8x128xf32>
    %6 = arith.addf %3, %5 : vector<8x128xf32>
    %cst_5 = arith.constant 0.000000e+00 : f32
    %7 = vector.broadcast %cst_5 : f32 to vector<8x128xf32>
    %8 = arith.maximumf %6, %7 : vector<8x128xf32>
    %9 = arith.truncf %8 : vector<8x128xf32> to vector<8x128xbf16>
    %c0_6 = arith.constant 0 : index
    %c0_7 = arith.constant 0 : index
    %10 = vector.load %arg3[%c0_6, %c0_7] : memref<128x128xbf16, #tpu.memory_space<vmem>>, vector<128x128xbf16>
    %cst_8 = arith.constant dense<0.000000e+00> : vector<8x128xf32>
    %11 = tpu.matmul %9, %10, %cst_8 {dimension_numbers = #tpu.dot_dimension_numbers<[1], [0], [0], [1], [0, 0, 1, 1], [], []>} : vector<8x128xbf16>, vector<128x128xbf16>, vector<8x128xf32> -> vector<8x128xf32>
    %c0_9 = arith.constant 0 : index
    %c0_10 = arith.constant 0 : index
    %12 = vector.load %arg4[%c0_9, %c0_10] : memref<1x128xf32, #tpu.memory_space<vmem>>, vector<1x128xf32>
    %13 = vector.broadcast %12 : vector<1x128xf32> to vector<8x128xf32>
    %14 = arith.addf %11, %13 : vector<8x128xf32>
    %cst_11 = arith.constant 0.000000e+00 : f32
    %15 = vector.broadcast %cst_11 : f32 to vector<8x128xf32>
    %16 = arith.maximumf %14, %15 : vector<8x128xf32>
    %17 = arith.truncf %16 : vector<8x128xf32> to vector<8x128xbf16>
    %c0_12 = arith.constant 0 : index
    %c0_13 = arith.constant 0 : index
    %18 = vector.load %arg5[%c0_12, %c0_13] : memref<128x128xbf16, #tpu.memory_space<vmem>>, vector<128x128xbf16>
    %cst_14 = arith.constant dense<0.000000e+00> : vector<8x128xf32>
    %19 = tpu.matmul %17, %18, %cst_14 {dimension_numbers = #tpu.dot_dimension_numbers<[1], [0], [0], [1], [0, 0, 1, 1], [], []>} : vector<8x128xbf16>, vector<128x128xbf16>, vector<8x128xf32> -> vector<8x128xf32>
    %c0_15 = arith.constant 0 : index
    %c0_16 = arith.constant 0 : index
    %20 = vector.load %arg6[%c0_15, %c0_16] : memref<1x128xf32, #tpu.memory_space<vmem>>, vector<1x128xf32>
    %21 = vector.broadcast %20 : vector<1x128xf32> to vector<8x128xf32>
    %22 = arith.addf %19, %21 : vector<8x128xf32>
    %cst_17 = arith.constant 0.000000e+00 : f32
    %23 = vector.broadcast %cst_17 : f32 to vector<8x128xf32>
    %24 = arith.maximumf %22, %23 : vector<8x128xf32>
    %25 = arith.truncf %24 : vector<8x128xf32> to vector<8x128xbf16>
    %c0_18 = arith.constant 0 : index
    %c0_19 = arith.constant 0 : index
    %26 = vector.load %arg7[%c0_18, %c0_19] : memref<8x128xbf16, #tpu.memory_space<vmem>>, vector<8x128xbf16>
    "tpu.trace_start"() <{level = 10 : i32, message = "oh,bh->ob"}> : () -> ()
    %cst_20 = arith.constant dense<0.000000e+00> : vector<8x8xf32>
    %27 = tpu.matmul %26, %25, %cst_20 {dimension_numbers = #tpu.dot_dimension_numbers<[1], [1], [0], [0], [0, 0, 1, 0], [], []>} : vector<8x128xbf16>, vector<8x128xbf16>, vector<8x8xf32> -> vector<8x8xf32>
    "tpu.trace_stop"() : () -> ()
    %c0_21 = arith.constant 0 : index
    %c0_22 = arith.constant 0 : index
    %28 = vector.load %arg8[%c0_21, %c0_22] : memref<8x1xf32, #tpu.memory_space<vmem>>, vector<8x1xf32>
    %29 = vector.broadcast %28 : vector<8x1xf32> to vector<8x8xf32>
    %30 = arith.addf %27, %29 : vector<8x8xf32>
    %31 = vector.extract_strided_slice %30 {offsets = [0, 0], sizes = [1, 8], strides = [1, 1]} : vector<8x8xf32> to vector<1x8xf32>
    %c0_23 = arith.constant 0 : index
    %c0_24 = arith.constant 0 : index
    %c0_25 = arith.constant 0 : index
    %32 = vector.load %arg9[%c0_23, %c0_24, %c0_25] : memref<1x1x8xf32, #tpu.memory_space<vmem>>, vector<1x1x8xf32>
    %33 = vector.shape_cast %32 : vector<1x1x8xf32> to vector<1x8xf32>
    %34 = vector.shape_cast %31 : vector<1x8xf32> to vector<1x1x8xf32>
    tpu.vector_store %arg9[%c0_23, %c0_24, %c0_25], %34 {strides = array<i32>} : memref<1x1x8xf32, #tpu.memory_space<vmem>>, vector<1x1x8xf32>,
    return
  }
}

</mosaic_0001>

<bundles_post_ra>
// kernel: tpu_custom_call.1
= control target key start
LH: loop header
LB: loop body
LE: loop exit
PB: predicated region body
PF: predicated region fallthrough
CT: control target
= control target key end

     0   :  { %14 = vsyncpa [#allocation3], 0  ;;  %s812_s0 = inlined_call_operand.vmem [shape: f32[8,16], index: 0, kind: input, shape index: {}]   ;;  %s813_s1 = inlined_call_operand.hbm [shape: bf16[16,128], index: 1, kind: input, shape index: {}]   ;;  %s814_s2 = inlined_call_operand.vmem [shape: f32[1,128], index: 2, kind: input, shape index: {}]   ;;  %s815_s3 = inlined_call_operand.hbm [shape: bf16[128,128], index: 3, kind: input, shape index: {}]   ;;  %s816_s4 = inlined_call_operand.vmem [shape: f32[1,128], index: 4, kind: input, shape index: {}]   ;;  %s817_s5 = inlined_call_operand.hbm [shape: bf16[128,128], index: 5, kind: input, shape index: {}]   ;;  %s818_s6 = inlined_call_operand.vmem [shape: f32[1,128], index: 6, kind: input, shape index: {}]   ;;  %s819_s7 = inlined_call_operand.vmem [shape: bf16[8,128], index: 7, kind: input, shape index: {}]   ;;  %s820_s8 = inlined_call_operand.vmem [shape: f32[8,1], index: 8, kind: input, shape index: {}]   ;;  %s821_s9 = inlined_call_operand.hbm [shape: f32[1,1,8], index: 9, kind: output, shape index: {}]  }
   0x1   :  { %15 = vsyncpa [#allocation6], 0 }
   0x2   :  { %16 = vsyncpa [#allocation4], 0  ;;  %s645_s30 = smov [#allocation5]   ;;  %s646_s11 = smov [#allocation2]  }
   0x3   :  { %s38_s10 = sshll.u32 %s645_s30, 4  ;;  %s24_s12 = sshll.u32 %s646_s11, 4  ;;  %s39_s10 = int_to_ptr.vmem [resolvable:$true] %s38_s10  ;;  %s704_s12 = int_to_ptr.vmem [resolvable:$true] %s24_s12 }
   0x4   :  { %s551_s15 = scalar_lea.hbm %s815_s3, 1024 }
   0x5   :  { %p552_p0 = scmp.ne.s32.totalorder %s815_s3, %s551_s15  ;;  %p555_p1 = scmp.lt.u32.totalorder %s551_s15, %s815_s3 }
   0x7   :  { %p557_p2 = pnand %p555_p1, %p552_p0 }
   0x9   :  { %560 = shalt.err (!%p557_p2)
}
   0xa   :  { %s561_s20 = scalar_lea.vmem %s39_s10, 1024  ;;  %p566_p4 = scmp.lt.s32.totalorder %s39_s10, %s39_s10 }
   0xb   :  { %p562_p3 = scmp.ne.s32.totalorder %s39_s10, %s561_s20  ;;  %p567_p5 = scmp.lt.s32.totalorder %s561_s20, %s561_s20 }
   0xd   :  { %p568_p6 = por %p567_p5, %p566_p4 }
   0xf   :  { %p569_p7 = pnand %p568_p6, %p562_p3 }
  0x11   :  { %572 = shalt.err (!%p569_p7)
}
  0x12   :  { %s647_s21 = smov 64   ;;  %s648_s22 = smov 4  }
  0x13   :  { %44 = dma.hbm_to_vmem [thread:$0]  %s815_s3, 1024, %s39_s10, [#allocation6], %s647_s21, %s647_s21, %s648_s22  }
  0x14   :  { %s573_s27 = scalar_lea.hbm %s813_s1, 128 }
  0x15   :  { %p574_p8 = scmp.ne.s32.totalorder %s813_s1, %s573_s27  ;;  %p577_p9 = scmp.lt.u32.totalorder %s573_s27, %s813_s1 }
  0x17   :  { %p579_p10 = pnand %p577_p9, %p574_p8 }
  0x19   :  { %582 = shalt.err (!%p579_p10)
}
  0x1a   :  { %s583_s13 = scalar_lea.vmem %s704_s12, 128  ;;  %p588_p12 = scmp.lt.s32.totalorder %s704_s12, %s704_s12 }
  0x1b   :  { %p584_p11 = scmp.ne.s32.totalorder %s704_s12, %s583_s13  ;;  %p589_p13 = scmp.lt.s32.totalorder %s583_s13, %s583_s13 }
  0x1d   :  { %p590_p0 = por %p589_p13, %p588_p12 }
  0x1f   :  { %p591_p1 = pnand %p590_p0, %p584_p11 }
  0x21   :  { %594 = shalt.err (!%p591_p1)
}
  0x22   :  { %30 = dma.hbm_to_vmem [thread:$0]  %s813_s1, 128, %s704_s12, [#allocation3], %s647_s21, %s647_s21, %s648_s22  }
  0x23   :  { %s649_s14 = smov [#allocation7]   ;;  %s595_s18 = scalar_lea.hbm %s817_s5, 1024 }
  0x24   :  { %s52_s15 = sshll.u32 %s649_s14, 4  ;;  %p596_p2 = scmp.ne.s32.totalorder %s817_s5, %s595_s18  ;;  %s53_s15 = int_to_ptr.vmem [resolvable:$true] %s52_s15 }
  0x25   :  { %p599_p3 = scmp.lt.u32.totalorder %s595_s18, %s817_s5 }
  0x27   :  { %p601_p4 = pnand %p599_p3, %p596_p2 }
  0x29   :  { %604 = shalt.err (!%p601_p4)
}
  0x2a   :  { %s605_s25 = scalar_lea.vmem %s53_s15, 1024  ;;  %p610_p6 = scmp.lt.s32.totalorder %s53_s15, %s53_s15 }
  0x2b   :  { %p606_p5 = scmp.ne.s32.totalorder %s53_s15, %s605_s25  ;;  %p611_p7 = scmp.lt.s32.totalorder %s605_s25, %s605_s25 }
  0x2d   :  { %p612_p8 = por %p611_p7, %p610_p6 }
  0x2f   :  { %p613_p9 = pnand %p612_p8, %p606_p5 }
  0x31   :  { %616 = shalt.err (!%p613_p9)
}
  0x32   :  { %58 = dma.hbm_to_vmem [thread:$0]  %s817_s5, 1024, %s53_s15, [#allocation6], %s647_s21, %s647_s21, %s648_s22  }
  0x33   :  { %639 = dma.done.wait [#allocation3], 128  }
  0x34   :  { %640 = vsyncadd [#allocation3], 4294967168 }
  0x35   :  { %641 = dma.done.wait [#allocation6], 2048  }
  0x36   :  { %642 = vsyncadd [#allocation6], 4294965248  ;;  %v650_v0 = vmov 0.0   ;;  %vm651_vm0 = vmmov 0   ;;  %v534_v1 = vld [vmem:[#allocation2] sm:$0xff]   ;;  %vm92_vm1 = vcmask 130048  }
  0x37   :  { %472 = vmatprep.subr.bf16.mxu0 %v650_v0  ;;  %474 = vmatprep.mubr.msk.bf16.mxu0 %vm651_vm0, %v650_v0  ;;  %v75_v2 = vld [vmem:[%s812_s0] sm:$0xff]  ;;  %v535_v4 = vld [vmem:[#allocation5] sm:$0xff]   ;;  %v536_v5 = vld [vmem:[#allocation5 + $0x8] sm:$0xff]   ;;  %v652_v37 = vmov 0   ;;  %vm411_vm2 = vcmask 57344  }
  0x38   :  { %478 = vmatprep.subr.bf16.mxu1 %v650_v0  ;;  %494 = vmatprep.mubr.msk.bf16.mxu1 %vm651_vm0, %v650_v0  ;;  %v76_v3 = vpack.c.bf16 %v75_v2, %v75_v2  ;;  %v537_v6 = vld [vmem:[#allocation5 + $0x10] sm:$0xff]   ;;  %v538_v7 = vld [vmem:[#allocation5 + $0x18] sm:$0xff]   ;;  %v539_v8 = vld [vmem:[#allocation5 + $0x20] sm:$0xff]  }
  0x39   :  { %473 = vmatpush3.bf16.msra.mxu0 %v534_v1  ;;  %479 = vmatpush3.bf16.msra.mxu1 %v535_v4  ;;  %v540_v9 = vld [vmem:[#allocation5 + $0x28] sm:$0xff]   ;;  %v541_v10 = vld [vmem:[#allocation5 + $0x30] sm:$0xff]   ;;  %v542_v11 = vld [vmem:[#allocation5 + $0x38] sm:$0xff]  }
  0x3a   :  { %498 = vmatprep.subr.bf16.mxu0 %v650_v0  ;;  %480 = vmatprep.subr.bf16.mxu1 %v650_v0  ;;  %v543_v12 = vld [vmem:[#allocation7] sm:$0xff]   ;;  %v544_v13 = vld [vmem:[#allocation7 + $0x8] sm:$0xff]   ;;  %v545_v14 = vld [vmem:[#allocation7 + $0x10] sm:$0xff]  }
  0x3b   :  { %v546_v15 = vld [vmem:[#allocation7 + $0x18] sm:$0xff]   ;;  %v547_v16 = vld [vmem:[#allocation7 + $0x20] sm:$0xff]   ;;  %v548_v17 = vld [vmem:[#allocation7 + $0x28] sm:$0xff]   ;;  %533 = vset.pattern.permute.xlu0 %v652_v37 }
  0x3c   :  { %475 = vmatmul.mubr.msk.bf16.vlgmr.msra.gmra.mrb[0].mxu0 %vm92_vm1, %v76_v3  ;;  %v429_v18 = vld [vmem:[%s814_s2] ss:$0 sm:$0xff]  ;;  %v549_v26 = vld [vmem:[#allocation7 + $0x30] sm:$0xff]  }
  0x3d   :  { %514 = vmatprep.mubr.msk.bf16.mxu0 %vm651_vm0, %v650_v0  ;;  %481 = vmatpush3.bf16.msra.mxu1 %v536_v5  ;;  %v550_v27 = vld [vmem:[#allocation7 + $0x38] sm:$0xff]  }
  0x3e   :  { %482 = vmatprep.subr.bf16.mxu1 %v650_v0  ;;  %499 = vmatpush3.bf16.msra.mxu0 %v543_v12  ;;  %v432_v28 = vld [vmem:[%s816_s4] ss:$0 sm:$0xff] }
  0x3f   :  { %500 = vmatprep.subr.bf16.mxu0 %v650_v0  ;;  %v365_v36 = vld [vmem:[%s820_s8] sm:$0xff]  ;;  %s653_s8 = smov [#allocation8]  }
  0x40   :  { %368 = vperm.xlu0 %533, %v365_v36   ;;  %v441_v38 = vld [vmem:[%s818_s6] ss:$0 sm:$0xff]  ;;  %s419_s13 = sshll.u32 %s653_s8, 4  ;;  %s420_s13 = int_to_ptr.vmem [resolvable:$true] %s419_s13 }
  0x41   :  { %483 = vmatpush3.bf16.msra.mxu1 %v537_v6  ;;  %v364_v46 = vld [vmem:[%s819_s7] sm:$0xf]  ;;  %s617_s6 = scalar_lea.vmem %s420_s13, 16  ;;  %s621_s3 = scalar_lea.vmem %s420_s13, 32 }
  0x42   :  { %484 = vmatprep.subr.bf16.mxu1 %v650_v0  ;;  %501 = vmatpush3.bf16.msra.mxu0 %v544_v13  ;;  %p618_p10 = scmp.ne.s32.totalorder %s420_s13, %s617_s6  ;;  %p622_p11 = scmp.lt.s32.totalorder %s420_s13, %s420_s13 }
  0x43   :  { %502 = vmatprep.subr.bf16.mxu0 %v650_v0  ;;  %p623_p12 = scmp.lt.s32.totalorder %s621_s3, %s617_s6 }
  0x45   :  { %485 = vmatpush3.bf16.msra.mxu1 %v538_v7  ;;  %p624_p13 = por %p623_p12, %p622_p11 }
  0x46   :  { %486 = vmatprep.subr.bf16.mxu1 %v650_v0  ;;  %503 = vmatpush3.bf16.msra.mxu0 %v545_v14 }
  0x47   :  { %504 = vmatprep.subr.bf16.mxu0 %v650_v0  ;;  %p625_p0 = pnand %p624_p13, %p618_p10 }
  0x49   :  { %487 = vmatpush3.bf16.msra.mxu1 %v539_v8 }
  0x4a   :  { %488 = vmatprep.subr.bf16.mxu1 %v650_v0  ;;  %505 = vmatpush3.bf16.msra.mxu0 %v546_v15 }
  0x4b   :  { %506 = vmatprep.subr.bf16.mxu0 %v650_v0 }
  0x4d   :  { %489 = vmatpush3.bf16.msra.mxu1 %v540_v9 }
  0x4e   :  { %490 = vmatprep.subr.bf16.mxu1 %v650_v0  ;;  %507 = vmatpush3.bf16.msra.mxu0 %v547_v16 }
  0x4f   :  { %508 = vmatprep.subr.bf16.mxu0 %v650_v0 }
  0x51   :  { %491 = vmatpush3.bf16.msra.mxu1 %v541_v10 }
  0x52   :  { %492 = vmatprep.subr.bf16.mxu1 %v650_v0  ;;  %509 = vmatpush3.bf16.msra.mxu0 %v548_v17 }
  0x53   :  { %510 = vmatprep.subr.bf16.mxu0 %v650_v0 }
  0x55   :  { %493 = vmatpush3.bf16.msra.mxu1 %v542_v11 }
  0x56   :  { %518 = vmatprep.subr.bf16.mxu1 %v650_v0  ;;  %511 = vmatpush3.bf16.msra.mxu0 %v549_v26 }
  0x57   :  { %512 = vmatprep.subr.bf16.mxu0 %v650_v0 }
  0x5a   :  { %513 = vmatpush3.bf16.msra.mxu0 %v550_v27 }
  0xbf   :  { %v369_v47 = vpop.permute.xlu0 %368 }
 0x10f   :  { %v130_v19 = vpop.f32.mrb[0].mxu0 }
 0x110   :  { %v131_v20 = vadd.f32 %v429_v18, %v130_v19  ;;  %v476_v21 = vpop.f32.mrb[1].mxu0 }
 0x111   :  { %v133_v22 = vpop.f32.mrb[2].mxu0 }
 0x112   :  { %v136_v23 = vmax.f32 %v131_v20, 0.0  ;;  %v477_v24 = vpop.f32.mrb[3].mxu0 }
 0x114   :  { %v137_v25 = vpack.c.bf16 %v136_v23, %v136_v23 }
 0x116   :  { %495 = vmatmul.mubr.bf16.vlgmr.msra.gmra.mrb[0].mxu1 %v137_v25 }
 0x117   :  { %520 = vmatprep.mubr.msk.bf16.mxu1 %vm651_vm0, %v650_v0 }
 0x1e9   :  { %v243_v29 = vpop.f32.mrb[0].mxu1 }
 0x1ea   :  { %v244_v30 = vadd.f32 %v432_v28, %v243_v29  ;;  %v496_v31 = vpop.f32.mrb[1].mxu1 }
 0x1eb   :  { %v246_v32 = vpop.f32.mrb[2].mxu1 }
 0x1ec   :  { %v249_v33 = vmax.f32 %v244_v30, 0.0  ;;  %v497_v34 = vpop.f32.mrb[3].mxu1 }
 0x1ee   :  { %v250_v35 = vpack.c.bf16 %v249_v33, %v249_v33 }
 0x1f0   :  { %515 = vmatmul.mubr.bf16.vlgmr.msra.gmra.mrb[4].mxu0 %v250_v35 }
 0x2c3   :  { %v356_v39 = vpop.f32.mrb[4].mxu0 }
 0x2c4   :  { %v357_v40 = vadd.f32 %v441_v38, %v356_v39  ;;  %v516_v41 = vpop.f32.mrb[5].mxu0 }
 0x2c5   :  { %v359_v42 = vpop.f32.mrb[6].mxu0 }
 0x2c6   :  { %v362_v43 = vmax.f32 %v357_v40, 0.0  ;;  %v517_v44 = vpop.f32.mrb[7].mxu0 }
 0x2c8   :  { %v363_v45 = vpack.c.bf16 %v362_v43, %v362_v43 }
 0x2ca   :  { %519 = vmatpush3.bf16.xpose.msra.mxu1 %v363_v45 }
 0x2d1   :  { %521 = vmatmul.mubr.bf16.vlgmr.msra.gmra.mrb[4].mxu1 %v364_v46 }
 0x3a4   :  { %v405_v48 = vpop.f32.mrb[4].mxu1 }
 0x3a5   :  { %v406_v49 = vadd.f32 %v405_v48, %v369_v47  ;;  %v522_v50 = vpop.f32.mrb[5].mxu1 }
 0x3a6   :  { %v408_v51 = vpop.f32.mrb[6].mxu1 }
 0x3a7   :  { %v523_v52 = vpop.f32.mrb[7].mxu1  ;;  %412 = vst.msk [vmem:[#allocation8] sm:$0x1] %vm411_vm2, %v406_v49 }
 0x3a8   :  { %628 = shalt.err (!%p625_p0)
}
 0x3a9   :  { %s629_s14 = scalar_lea.hbm %s821_s9, 16 }
 0x3aa   :  { %p630_p1 = scmp.ne.s32.totalorder %s821_s9, %s629_s14  ;;  %p633_p2 = scmp.lt.u32.totalorder %s629_s14, %s821_s9 }
 0x3ac   :  { %p635_p3 = pnand %p633_p2, %p630_p1 }
 0x3ae   :  { %638 = shalt.err (!%p635_p3)
}
 0x3af   :  { %422 = dma.vmem_to_hbm [thread:$0]  %s420_s13, 16, %s821_s9, [#allocation4]  }
 0x3b0   :  { %643 = dma.done.wait [#allocation4], 16  }
 0x3b1   :  { %644 = vsyncadd [#allocation4], 4294967280 }
 0x3b2   :  { %426 = vsyncpa [#allocation3], 1 }
 0x3b3   :  { %427 = vsyncpa [#allocation6], 1 }
 0x3b4   :  { %428 = vsyncpa [#allocation4], 1 }

</bundles_post_ra>
